<compile_context>
chip_gen: v7x
topology: tpu7x:2x2x1
jax: 0.10.0
libtpu: 0.0.40
codegen_flags: <defaults>
</compile_context>

<pallas_src>
import jax
import jax.numpy as jnp
from jax import lax
from jax.experimental import pallas as pl
from jax.experimental.pallas import tpu as pltpu

_IGNORE_INDEX = -100  # nn.CrossEntropyLoss default


def _make_kernel(n_valid, tile_n, need_mask):
    def kernel(y_ref, pred_ref, ce_ref, cnt_ref):
        logits_nat = pred_ref[0]                              # (TILE_N, C) native dtype
        tgt = y_ref[0]                                        # (TILE_N, 1) int32

        # Numerically-stable CE; upcast to f32 on the VMEM tile (after DMA).
        logits = logits_nat.astype(jnp.float32)
        m = jnp.max(logits, axis=1, keepdims=True)            # (TILE_N, 1)
        sum_e = jnp.sum(jnp.exp(logits - m), axis=1, keepdims=True)

        # Pick the target logit on the *native* tile (exactly one nonzero per
        # row, so the select+sum is exact even in bf16); upcast only (row, 1).
        col = lax.broadcasted_iota(jnp.int32, logits_nat.shape, 1)
        picked = jnp.sum(
            jnp.where(col == tgt, logits_nat, jnp.zeros_like(logits_nat)),
            axis=1, keepdims=True).astype(jnp.float32)        # (TILE_N, 1)

        ce = (m - picked) + jnp.log(sum_e)                    # (TILE_N, 1)

        # Row validity: ignore_index rows, plus (for a ragged last tile) rows
        # past the true batch size -- the partial edge block is undefined there.
        valid = tgt != _IGNORE_INDEX                          # (TILE_N, 1) bool
        if need_mask:
            t = pl.program_id(0)                              # batch-tile grid axis
            row = lax.broadcasted_iota(jnp.int32, ce.shape, 0) + t * tile_n
            valid = jnp.logical_and(valid, row < n_valid)

        ce = jnp.where(valid, ce, 0.0)
        ce_ref[0, 0] = jnp.sum(ce, axis=0, keepdims=True)                  # (1, 1)
        cnt_ref[0, 0] = jnp.sum(valid.astype(jnp.float32), axis=0,
                                keepdims=True)                             # (1, 1)
    return kernel


def _vmem_config():
    """Return (per-step VMEM working-set budget, vmem_limit_bytes) per generation."""
    cap = None
    try:
        cap = getattr(pltpu.get_tpu_info(), "vmem_capacity_bytes", None)
    except Exception:
        cap = None
    if cap is not None and cap >= 96 * 1024 * 1024:
        # v5e / v6e: 128 MiB physical VMEM -> big tiles, fewer grid steps.
        return 44 * 1024 * 1024, 80 * 1024 * 1024
    # v7x (64 MiB physical) or unknown generation: stay conservative.
    return 18 * 1024 * 1024, 32 * 1024 * 1024


def _pick_tile_n(n, c, itemsize, budget):
    """Largest batch tile whose double-buffered working set fits the budget."""
    sublane = {4: 8, 2: 16, 1: 32}.get(itemsize, 8)
    # Per-row bytes: 2x double-buffered native logits rows + up to ~4 live f32
    # (row, C) temporaries (upcast / shifted / exp / select) + (row, 1) slack.
    per_row = c * (2 * itemsize + 16) + 1024
    tile = min(budget // per_row, n)
    if tile >= n:
        return n                          # full dim is always a legal block size
    return max(sublane, (tile // sublane) * sublane)


def static_loss(weights, pred, y, *, tile_n=None):
    """weights: (n_out,), pred: (n_out, N, C) float, y: (n_out, N) int."""
    n_out, n, c = pred.shape
    budget, vmem_limit = _vmem_config()
    if tile_n is None:
        tile_n = _pick_tile_n(n, c, jnp.dtype(pred.dtype).itemsize, budget)
    num_tiles = pl.cdiv(n, tile_n)

    y3 = y.reshape(n_out, n, 1).astype(jnp.int32)
    kernel = _make_kernel(n, tile_n, need_mask=(n % tile_n != 0))

    ce_part, cnt_part = pl.pallas_call(
        kernel,
        out_shape=(
            jax.ShapeDtypeStruct((n_out, num_tiles, 1, 1), jnp.float32),
            jax.ShapeDtypeStruct((n_out, num_tiles, 1, 1), jnp.float32),
        ),
        grid_spec=pltpu.PrefetchScalarGridSpec(
            num_scalar_prefetch=0,
            # Long batch-tile axis first -> balanced v7x megacore sharding.
            grid=(num_tiles, n_out),
            in_specs=[
                pl.BlockSpec((1, tile_n, 1), lambda t, h: (h, t, 0)),   # targets
                pl.BlockSpec((1, tile_n, c), lambda t, h: (h, t, 0)),   # logits
            ],
            out_specs=[
                pl.BlockSpec((1, 1, 1, 1), lambda t, h: (h, t, 0, 0)),
                pl.BlockSpec((1, 1, 1, 1), lambda t, h: (h, t, 0, 0)),
            ],
        ),
        compiler_params=pltpu.CompilerParams(
            dimension_semantics=("parallel", "parallel"),
            vmem_limit_bytes=vmem_limit,
        ),
    )(y3, pred)

    ce_sum = ce_part.reshape(n_out, num_tiles).sum(axis=1)     # (n_out,)
    cnt = cnt_part.reshape(n_out, num_tiles).sum(axis=1)       # (n_out,)
    ce_mean = ce_sum / cnt            # PyTorch 'mean' = sum / #non-ignored rows
    return jnp.sum(weights.astype(jnp.float32) * ce_mean)


def _reference_loss(weights, pred, y):
    p = pred.astype(jnp.float32)
    lse = jax.nn.logsumexp(p, axis=-1)                                   # (n_out, N)
    safe_y = jnp.maximum(y, 0)
    picked = jnp.take_along_axis(p, safe_y[..., None], axis=-1)[..., 0]  # (n_out, N)
    valid = (y != _IGNORE_INDEX)
    ce = jnp.sum(jnp.where(valid, lse - picked, 0.0), axis=-1) / jnp.sum(valid, axis=-1)
    return jnp.sum(weights * ce)


if __name__ == "__main__":
    n_out, C = 3, 16
    # Deterministic parameter init (stl_dim=-1 branch of __init__).
    weights = jnp.ones((n_out,), dtype=jnp.float32) / n_out

    key = jax.random.PRNGKey(0)
    k1, k2, k3 = jax.random.split(key, 3)

    # Case 1: small exact-tile f32.
    N = 8
    pred = jax.random.normal(k1, (n_out, N, C), dtype=jnp.float32)
    y = jax.random.randint(k2, (n_out, N), 0, C, dtype=jnp.int32)
    loss = static_loss(weights, pred, y)
    jax.block_until_ready(loss)
    ref = _reference_loss(weights, pred, y)
    assert jnp.allclose(loss, ref, atol=1e-5, rtol=1e-5), ("case1", loss, ref)

    # Case 2: ragged batch (N % tile_n != 0 -> partial edge block, no pad)
    # plus a couple of ignore_index=-100 targets.
    N2 = 20
    pred2 = jax.random.normal(k3, (n_out, N2, C), dtype=jnp.float32)
    y2 = jax.random.randint(k2, (n_out, N2), 0, C, dtype=jnp.int32)
    y2 = y2.at[0, 3].set(_IGNORE_INDEX).at[2, 17].set(_IGNORE_INDEX)
    loss2 = static_loss(weights, pred2, y2, tile_n=8)
    jax.block_until_ready(loss2)
    ref2 = _reference_loss(weights, pred2, y2)
    assert jnp.allclose(loss2, ref2, atol=1e-5, rtol=1e-5), ("case2", loss2, ref2)

    # Case 3: bf16 logits streamed in native dtype (ragged tile as well).
    pred3 = pred2.astype(jnp.bfloat16)
    loss3 = static_loss(weights, pred3, y2, tile_n=8)
    jax.block_until_ready(loss3)
    ref3 = _reference_loss(weights, pred3, y2)
    assert jnp.allclose(loss3, ref3, atol=1e-4, rtol=1e-4), ("case3", loss3, ref3)

    print("KERNEL_OK")
</pallas_src>

<mosaic_0001>
module attributes {stable_mosaic.version = 11 : i64} {
  func.func @kernel(%arg0: i32, %arg1: i32, %arg2: memref<1x8x1xi32, #tpu.memory_space<vmem>>, %arg3: memref<1x8x16xf32, #tpu.memory_space<vmem>>, %arg4: memref<1x1x1x1xf32, #tpu.memory_space<vmem>>, %arg5: memref<1x1x1x1xf32, #tpu.memory_space<vmem>>) attributes {dimension_semantics = [#tpu.dimension_semantics<parallel>, #tpu.dimension_semantics<parallel>], iteration_bounds = array<i64: 1, 3>, scalar_prefetch = 0 : i64, scratch_operands = 0 : i64, tpu.core_type = #tpu.core_type<tc>, window_params = [{transform_indices = @transform_0, window_bounds = array<i64: 1, 8, 1>}, {transform_indices = @transform_1, window_bounds = array<i64: 1, 8, 16>}, {transform_indices = @transform_2, window_bounds = array<i64: 1, 1, 1, 1>}, {transform_indices = @transform_3, window_bounds = array<i64: 1, 1, 1, 1>}]} {
    %c0 = arith.constant 0 : index
    %c0_0 = arith.constant 0 : index
    %c0_1 = arith.constant 0 : index
    %0 = vector.load %arg3[%c0, %c0_0, %c0_1] : memref<1x8x16xf32, #tpu.memory_space<vmem>>, vector<1x8x16xf32>
    %1 = vector.shape_cast %0 : vector<1x8x16xf32> to vector<8x16xf32>
    %c0_2 = arith.constant 0 : index
    %c0_3 = arith.constant 0 : index
    %c0_4 = arith.constant 0 : index
    %2 = vector.load %arg2[%c0_2, %c0_3, %c0_4] : memref<1x8x1xi32, #tpu.memory_space<vmem>>, vector<1x8x1xi32>
    %3 = vector.shape_cast %2 : vector<1x8x1xi32> to vector<8x1xi32>
    %cst = arith.constant dense<0xFF800000> : vector<8xf32>
    %4 = vector.multi_reduction <maximumf>, %1, %cst [1] : vector<8x16xf32> to vector<8xf32>
    %5 = vector.shape_cast %4 : vector<8xf32> to vector<8x1xf32>
    %6 = vector.broadcast %5 : vector<8x1xf32> to vector<8x16xf32>
    %7 = arith.subf %1, %6 : vector<8x16xf32>
    %8 = math.exp %7 : vector<8x16xf32>
    %cst_5 = arith.constant dense<0.000000e+00> : vector<8xf32>
    %9 = vector.multi_reduction <add>, %8, %cst_5 [1] : vector<8x16xf32> to vector<8xf32>
    %10 = vector.shape_cast %9 : vector<8xf32> to vector<8x1xf32>
    %11 = tpu.iota {dimensions = array<i32: 1>} : vector<8x16xi32>
    %12 = vector.broadcast %3 : vector<8x1xi32> to vector<8x16xi32>
    %13 = arith.cmpi eq, %11, %12 : vector<8x16xi32>
    %cst_6 = arith.constant 0.000000e+00 : f32
    %14 = vector.broadcast %cst_6 : f32 to vector<8x16xf32>
    %15 = arith.select %13, %1, %14 : vector<8x16xi1>, vector<8x16xf32>
    %cst_7 = arith.constant dense<0.000000e+00> : vector<8xf32>
    %16 = vector.multi_reduction <add>, %15, %cst_7 [1] : vector<8x16xf32> to vector<8xf32>
    %17 = vector.shape_cast %16 : vector<8xf32> to vector<8x1xf32>
    %18 = arith.subf %5, %17 : vector<8x1xf32>
    %19 = math.log %10 : vector<8x1xf32>
    %20 = arith.addf %18, %19 : vector<8x1xf32>
    %c-100_i32 = arith.constant -100 : i32
    %21 = vector.broadcast %c-100_i32 : i32 to vector<8x1xi32>
    %22 = arith.cmpi ne, %3, %21 : vector<8x1xi32>
    %cst_8 = arith.constant 0.000000e+00 : f32
    %23 = vector.broadcast %cst_8 : f32 to vector<8x1xf32>
    %24 = arith.select %22, %20, %23 : vector<8x1xi1>, vector<8x1xf32>
    %cst_9 = arith.constant dense<0.000000e+00> : vector<1xf32>
    %25 = vector.multi_reduction <add>, %24, %cst_9 [0] : vector<8x1xf32> to vector<1xf32>
    %26 = vector.shape_cast %25 : vector<1xf32> to vector<1x1xf32>
    %c0_10 = arith.constant 0 : index
    %c0_11 = arith.constant 0 : index
    %c0_12 = arith.constant 0 : index
    %c0_13 = arith.constant 0 : index
    %27 = vector.load %arg4[%c0_10, %c0_11, %c0_12, %c0_13] : memref<1x1x1x1xf32, #tpu.memory_space<vmem>>, vector<1x1x1x1xf32>
    %28 = vector.shape_cast %27 : vector<1x1x1x1xf32> to vector<1x1xf32>
    %29 = vector.shape_cast %26 : vector<1x1xf32> to vector<1x1x1x1xf32>
    tpu.vector_store %arg4[%c0_10, %c0_11, %c0_12, %c0_13], %29 {strides = array<i32>} : memref<1x1x1x1xf32, #tpu.memory_space<vmem>>, vector<1x1x1x1xf32>,
    %30 = arith.extui %22 : vector<8x1xi1> to vector<8x1xi32>
    %31 = arith.sitofp %30 : vector<8x1xi32> to vector<8x1xf32>
    %cst_14 = arith.constant dense<0.000000e+00> : vector<1xf32>
    %32 = vector.multi_reduction <add>, %31, %cst_14 [0] : vector<8x1xf32> to vector<1xf32>
    %33 = vector.shape_cast %32 : vector<1xf32> to vector<1x1xf32>
    %c0_15 = arith.constant 0 : index
    %c0_16 = arith.constant 0 : index
    %c0_17 = arith.constant 0 : index
    %c0_18 = arith.constant 0 : index
    %34 = vector.load %arg5[%c0_15, %c0_16, %c0_17, %c0_18] : memref<1x1x1x1xf32, #tpu.memory_space<vmem>>, vector<1x1x1x1xf32>
    %35 = vector.shape_cast %34 : vector<1x1x1x1xf32> to vector<1x1xf32>
    %36 = vector.shape_cast %33 : vector<1x1xf32> to vector<1x1x1x1xf32>
    tpu.vector_store %arg5[%c0_15, %c0_16, %c0_17, %c0_18], %36 {strides = array<i32>} : memref<1x1x1x1xf32, #tpu.memory_space<vmem>>, vector<1x1x1x1xf32>,
    return
  }
  func.func @transform_0(%arg0: i32, %arg1: i32) -> (i32, i32, i32) {
    %c0_i32 = arith.constant 0 : i32
    %c0_i32_0 = arith.constant 0 : i32
    return %arg1, %arg0, %c0_i32 : i32, i32, i32
  }
  func.func @transform_1(%arg0: i32, %arg1: i32) -> (i32, i32, i32) {
    %c0_i32 = arith.constant 0 : i32
    %c0_i32_0 = arith.constant 0 : i32
    return %arg1, %arg0, %c0_i32 : i32, i32, i32
  }
  func.func @transform_2(%arg0: i32, %arg1: i32) -> (i32, i32, i32, i32) {
    %c0_i32 = arith.constant 0 : i32
    %c0_i32_0 = arith.constant 0 : i32
    %c0_i32_1 = arith.constant 0 : i32
    return %arg1, %arg0, %c0_i32, %c0_i32_0 : i32, i32, i32, i32
  }
  func.func @transform_3(%arg0: i32, %arg1: i32) -> (i32, i32, i32, i32) {
    %c0_i32 = arith.constant 0 : i32
    %c0_i32_0 = arith.constant 0 : i32
    %c0_i32_1 = arith.constant 0 : i32
    return %arg1, %arg0, %c0_i32, %c0_i32_0 : i32, i32, i32, i32
  }
}

</mosaic_0001>

<bundles_post_ra>
// kernel: tpu_custom_call.1
= control target key start
LH: loop header
LB: loop body
LE: loop exit
PB: predicated region body
PF: predicated region fallthrough
CT: control target
= control target key end

     0   :  { %s493_s12 = smov 0   ;;  %s495_s13 = smov 0   ;;  %s546_s0 = inlined_call_operand.vmem [shape: s32[3,8,1], index: 0, kind: input, shape index: {}]   ;;  %s547_s1 = inlined_call_operand.vmem [shape: f32[3,8,16], index: 1, kind: input, shape index: {}]   ;;  %s548_s2 = inlined_call_operand.vmem [shape: f32[3,1,1,1], index: 2, kind: output, shape index: {0}]   ;;  %s549_s3 = inlined_call_operand.vmem [shape: f32[3,1,1,1], index: 3, kind: output, shape index: {1}]  }
   0x1   :  { %s497_s14 = smov 0  }
   0x2 LB: > { %s23_s15 = sadd.s32 1, %s465_s13  ;;  %p410_p0 = scmp.ge.s32.totalorder %s469_s14, 1  ;;  %s469_s14 = sphi %s497_s14, %s14_s14   ;;  %s465_s13 = sphi %s495_s13, %s551_s13   ;;  %s461_s12 = sphi %s493_s12, %s550_s12  }
   0x3   : > { %p24_p1 = scmp.ge.s32.totalorder %s23_s15, 3  ;;  %p174_p2 = scmp.lt.s32.totalorder %s469_s14, 4 }
   0x5   : > { %s553_s15 = smov (%p24_p1, %s23_s15), 0  ;;  %p175_p3 = pnand %p410_p0, %p174_p2 }
   0x6   : > { %p214_p4 = scmp.lt.s32.totalorder (!%p175_p3), %s461_s12, 2  ;;  %v471_v0 = vmov (!%p175_p3), 0   ;;  %vm242_vm0 = vcmask (!%p175_p3), 130048   ;;  %vm268_vm1 = vcmask (!%p175_p3), 7168   ;;  %v472_v4 = vmov (!%p175_p3), 0.0  }
   0x7   : > { %178 = sbr.rel (%p175_p3) target bundleno = 349 (0x15d), region = 28  ;;  %442 = vset.pattern.permute.xlu0 (!%p175_p3), %v471_v0  ;;  %vm276_vm3 = vcmask (!%p175_p3), 0   ;;  %v252_v16 = vlaneseq (!%p175_p3) }
   0x9   : > { %v253_v17 = vand.u32 (!%p175_p3), 127, %v252_v16 }
   0xe   : > { %s555_s12 = smov (!%p214_p4, %s461_s12), 2 }
   0xf   : > { %s411_s16 = sshll.u32 %s555_s12, 3  ;;  %s239_s25 = scalar_lea.vmem %s549_s3, %s555_s12 }
  0x10   : > { %s227_s19 = scalar_lea.vmem %s547_s1, %s411_s16  ;;  %s220_s22 = scalar_lea.vmem %s546_s0, %s411_s16 }
  0x11   : > { %v240_v1 = vld [vmem:[%s227_s19] sm:$0xff]  ;;  %s233_s28 = scalar_lea.vmem %s548_s2, %s555_s12 }
  0x12   : > { %v243_v2 = vsel %vm242_vm0, %v240_v1, -inf  ;;  %v241_v3 = vld [vmem:[%s220_s22] sm:$0xff] }
  0x13   : > { %244 = vmax.xlane.f32.xlu0 %v243_v2  ;;  %vm266_vm2 = vcmp.ne.s32.totalorder %v241_v3, 4294967196 }
  0x14   : > { %v413_v5 = vsel %vm266_vm2, 1.0, %v472_v4 }
  0x15   : > { %v280_v6 = vsel %vm268_vm1, %v413_v5, 0.0 }
  0x16   : > { %v281_v7 = vrot.slane %v280_v6, 4 }
  0x18   : > { %v282_v8 = vadd.f32 %v281_v7, %v280_v6 }
  0x1a   : > { %v283_v9 = vrot.slane %v282_v8, 2 }
  0x1c   : > { %v284_v10 = vadd.f32 %v283_v9, %v282_v8 }
  0x1e   : > { %v285_v11 = vrot.slane %v284_v10, 1 }
  0x20   : > { %v286_v12 = vadd.f32 %v285_v11, %v284_v10 }
  0x22   : > { %287 = vst.msk [vmem:[%s239_s25] sm:$0x1] %vm276_vm3, %v286_v12 }
  0x29   : > { %255 = vperm.xlu0 %442, %v241_v3  }
  0xa0   : > { %v245_v13 = vpop.xlane.xlu0 %244 }
  0xa1   : > { %v246_v14 = vsub.f32 %v240_v1, %v245_v13 }
  0xa3   : > { %v247_v15 = vmul.f32 1.442695, %v246_v14 }
  0xa5   : > { %443 = vpow2.f32 %v247_v15 }
  0xa8   : > { %v256_v18 = vpop.permute.xlu0 %255 }
  0xa9   : > { %vm257_vm4 = vcmp.eq.s32.totalorder %v253_v17, %v256_v18 }
  0xaa   : > { %v258_v20 = vsel %vm257_vm4, %v240_v1, 0.0 }
  0xab   : > { %v259_v22 = vsel %vm242_vm0, %v258_v20, 0.0 }
  0xaf   : > { %v444_v19 = vpop.eup %443 }
  0xb0   : > { %v249_v21 = vsel %vm242_vm0, %v444_v19, 0.0 }
  0xb1   : > { %250 = vadd.xlane.f32.xlu1 %v249_v21 }
  0xb5   : > { %260 = vadd.xlane.f32.xlu1 %v259_v22 }
 0x13e   : > { %v251_v23 = vpop.xlane.xlu1 %250 }
 0x13f   : > { %445 = vlog2.f32 %v251_v23 }
 0x142   : > { %v261_v24 = vpop.xlane.xlu1 %260 }
 0x143   : > { %v262_v27 = vsub.f32 %v245_v13, %v261_v24 }
 0x149   : > { %v446_v25 = vpop.eup %445 }
 0x14a   : > { %v264_v26 = vmul.f32 0.6931472, %v446_v25 }
 0x14c   : > { %v265_v28 = vadd.f32 %v264_v26, %v262_v27 }
 0x14e   : > { %v267_v29 = vsel %vm266_vm2, %v265_v28, 0.0 }
 0x14f   : > { %v269_v30 = vsel %vm268_vm1, %v267_v29, 0.0 }
 0x150   : > { %v270_v31 = vrot.slane %v269_v30, 4 }
 0x152   : > { %v271_v32 = vadd.f32 %v270_v31, %v269_v30 }
 0x154   : > { %v272_v33 = vrot.slane %v271_v32, 2 }
 0x156   : > { %v273_v34 = vadd.f32 %v272_v33, %v271_v32 }
 0x158   : > { %v274_v35 = vrot.slane %v273_v34, 1 }
 0x15a   : > { %v275_v36 = vadd.f32 %v274_v35, %v273_v34 }
 0x15c   : > { %277 = vst.msk [vmem:[%s233_s28] sm:$0x1] %vm276_vm3, %v275_v36 }
 0x15d PF: > { %s14_s14 = sadd.s32 1, %s469_s14   ;;  %s550_s12 = smov %s465_s13 }
 0x15e   : > { %p11_p5 = scmp.ge.s32.totalorder %s14_s14, 5   ;;  %s551_s13 = smov %s553_s15 }
 0x160   :  { %13 = sbr.rel (!%p11_p5) target bundleno = 2 (0x2), region = 73 }

</bundles_post_ra>
